<compile_context>
chip_gen: v5e
topology: v5e:2x2
jax: 0.10.0
libtpu: 0.0.40
codegen_flags: <defaults>
</compile_context>

<pallas_src>
import jax
import jax.numpy as jnp
from jax.experimental import pallas as pl
from jax.experimental.pallas import tpu as pltpu

_LANES = 128


def _sigmoid_kernel(x_ref, o_ref):
    # sigmoid(x) = 1 / (1 + exp(-x)); exp and reciprocal both run on the EUP.
    x = x_ref[...]
    z = jnp.exp(-x)
    o_ref[...] = pl.reciprocal(1.0 + z, approx=False).astype(o_ref.dtype)


def sigmoid_pallas(x: jax.Array, *, tile_rows: int = 8192) -> jax.Array:
    """Elementwise sigmoid via a Pallas TPU kernel (any input shape/dtype)."""
    orig_shape = x.shape
    dtype = x.dtype
    n = x.size
    if n == 0:
        return x

    # Clamp tile_rows to a positive multiple of 8 so (tile_rows, 128) blocks
    # always satisfy the (8, 128) divisibility constraint.
    tile_rows = max(8, (int(tile_rows) // 8) * 8)

    rem = n % _LANES
    if rem:
        # Rare fallback for numel not divisible by 128: minimal pad (<128 elems).
        # TODO(synk): a fully copy-free tail path would need a separate 1-D edge
        # kernel; aligned inputs (the common case) never take this branch.
        x_flat = jnp.pad(jnp.ravel(x), (0, _LANES - rem))
    else:
        x_flat = jnp.ravel(x)  # metadata-only reshape, no copy

    rows = x_flat.size // _LANES
    x2d = x_flat.reshape(rows, _LANES)

    if rows <= tile_rows:
        # Whole slab in one block; block == full array dims, so no alignment
        # constraint and no grid overhead.
        tr = rows
        grid = (1,)
    else:
        # Large fixed blocks; ragged last block is masked by Pallas.
        tr = tile_rows
        grid = (pl.cdiv(rows, tr),)

    itemsize = jnp.dtype(dtype).itemsize
    cost = pl.CostEstimate(
        flops=n, transcendentals=n, bytes_accessed=2 * n * itemsize
    )

    out2d = pl.pallas_call(
        _sigmoid_kernel,
        out_shape=jax.ShapeDtypeStruct((rows, _LANES), dtype),
        grid_spec=pltpu.PrefetchScalarGridSpec(
            num_scalar_prefetch=0,
            grid=grid,
            in_specs=[pl.BlockSpec((tr, _LANES), lambda i: (i, 0))],
            out_specs=pl.BlockSpec((tr, _LANES), lambda i: (i, 0)),
        ),
        compiler_params=pltpu.CompilerParams(
            dimension_semantics=("parallel",),
            # 2 operands x 2 pipeline buffers x 4 MiB block = 16 MiB; 48 MiB
            # leaves scratch headroom and stays under v7x's 64 MiB physical VMEM.
            vmem_limit_bytes=48 * 1024 * 1024,
        ),
        cost_estimate=cost,
    )(x2d)

    out_flat = out2d.reshape(-1)
    if rem:
        out_flat = out_flat[:n]
    return out_flat.reshape(orig_shape)


if __name__ == "__main__":
    # The Wxiao module has no parameters; forward(input) = sigmoid(input).
    key = jax.random.PRNGKey(0)
    x = jax.random.normal(key, (2, 4, 16, 16), dtype=jnp.float32)  # NCHW

    y = sigmoid_pallas(x)
    y = jax.block_until_ready(y)

    # Correctness check against plain JAX reference.
    y_ref = jax.nn.sigmoid(x)
    assert y.shape == x.shape and y.dtype == x.dtype
    assert jnp.max(jnp.abs(y - y_ref)) < 1e-5

    print("KERNEL_OK")
</pallas_src>

<mosaic_0001>
module attributes {stable_mosaic.version = 11 : i64} {
  func.func @_sigmoid_kernel(%arg0: i32, %arg1: memref<16x128xf32, #tpu.memory_space<vmem>>, %arg2: memref<16x128xf32, #tpu.memory_space<vmem>>) attributes {dimension_semantics = [#tpu.dimension_semantics<parallel>], iteration_bounds = array<i64: 1>, scalar_prefetch = 0 : i64, scratch_operands = 0 : i64, tpu.core_type = #tpu.core_type<tc>, window_params = [{transform_indices = @transform_0, window_bounds = array<i64: 16, 128>}, {transform_indices = @transform_1, window_bounds = array<i64: 16, 128>}]} {
    %c0 = arith.constant 0 : index
    %c0_0 = arith.constant 0 : index
    %0 = vector.load %arg1[%c0, %c0_0] : memref<16x128xf32, #tpu.memory_space<vmem>>, vector<16x128xf32>
    %cst = arith.constant 0.000000e+00 : f32
    %1 = vector.broadcast %cst : f32 to vector<16x128xf32>
    %2 = arith.subf %1, %0 : vector<16x128xf32>
    %3 = math.exp %2 : vector<16x128xf32>
    %cst_1 = arith.constant 1.000000e+00 : f32
    %4 = vector.broadcast %cst_1 : f32 to vector<16x128xf32>
    %5 = arith.addf %4, %3 : vector<16x128xf32>
    %6 = tpu.reciprocal %5 : vector<16x128xf32> -> vector<16x128xf32>
    %c0_2 = arith.constant 0 : index
    %c0_3 = arith.constant 0 : index
    %7 = vector.load %arg2[%c0_2, %c0_3] : memref<16x128xf32, #tpu.memory_space<vmem>>, vector<16x128xf32>
    tpu.vector_store %arg2[%c0_2, %c0_3], %6 {strides = array<i32>} : memref<16x128xf32, #tpu.memory_space<vmem>>, vector<16x128xf32>,
    return
  }
  func.func @transform_0(%arg0: i32) -> (i32, i32) {
    %c0_i32 = arith.constant 0 : i32
    %c0_i32_0 = arith.constant 0 : i32
    return %arg0, %c0_i32 : i32, i32
  }
  func.func @transform_1(%arg0: i32) -> (i32, i32) {
    %c0_i32 = arith.constant 0 : i32
    %c0_i32_0 = arith.constant 0 : i32
    return %arg0, %c0_i32 : i32, i32
  }
}

</mosaic_0001>

<bundles_post_ra>
// kernel: tpu_custom_call.1
= control target key start
LH: loop header
LB: loop body
LE: loop exit
PB: predicated region body
PF: predicated region fallthrough
CT: control target
= control target key end

     0   :  { %6 = vsyncpa [#allocation3], 0  ;;  %s174_s0 = inlined_call_operand.hbm [shape: f32[16,128], index: 0, kind: input, shape index: {}]   ;;  %s175_s1 = inlined_call_operand.hbm [shape: f32[16,128], index: 1, kind: output, shape index: {}]  }
   0x1   :  { %7 = vsyncpa [#allocation4], 0  ;;  %s12_s8 = sshll.u32 %s174_s0, 4  ;;  %s148_s9 = smov [#allocation2]   ;;  %s13_s8 = int_to_ptr.hbm [resolvable:$true] %s12_s8 }
   0x2   :  { %s14_s10 = sshll.u32 %s148_s9, 4  ;;  %s149_s11 = smov 128   ;;  %s15_s10 = int_to_ptr.vmem [resolvable:$true] %s14_s10 }
   0x3   :  { %s150_s12 = smov 8  }
   0x4   :  { %20 = dma.hbm_to_vmem [thread:$0]  %s13_s8, 256, %s15_s10, [#allocation3], %s149_s11, %s149_s11, %s150_s12  }
   0x5   :  { %144 = dma.done.wait [#allocation3], 256  }
   0x6   :  { %145 = vsyncadd [#allocation3], 4294967040  ;;  %v25_v0 = vld [vmem:[#allocation2] sm:$0xff]  ;;  %v26_v1 = vld [vmem:[#allocation2 + $0x8] sm:$0xff]  ;;  %s151_s0 = smov [#allocation5]   ;;  %s71_s16 = sshll.u32 %s175_s1, 4  ;;  %s72_s16 = int_to_ptr.hbm [resolvable:$true] %s71_s16 }
   0x7   :  { %v27_v2 = vsub.f32 0.0, %v25_v0  ;;  %v28_v3 = vsub.f32 0.0, %v26_v1  ;;  %s69_s13 = sshll.u32 %s151_s0, 4  ;;  %s70_s13 = int_to_ptr.vmem [resolvable:$true] %s69_s13 }
   0x9   :  { %v29_v4 = vmul.f32 1.442695, %v27_v2  ;;  %v31_v5 = vmul.f32 1.442695, %v28_v3 }
   0xb   :  { %88 = vpow2.f32 %v29_v4 }
   0xc   :  { %90 = vpow2.f32 %v31_v5 }
  0x11   :  { %v89_v6 = vpop.eup %88 }
  0x12   :  { %v91_v7 = vpop.eup %90  ;;  %v33_v8 = vadd.f32 1.0, %v89_v6 }
  0x13   :  { %v34_v9 = vadd.f32 1.0, %v91_v7 }
  0x14   :  { %92 = vrcp.f32 %v33_v8  ;;  %vm40_vm0 = vweird.f32 %v33_v8  ;;  %v46_v13 = vand.u32 2147483648, %v33_v8  ;;  %v44_v16 = vand.u32 2147483647, %v33_v8 }
  0x15   :  { %94 = vrcp.f32 %v34_v9  ;;  %v60_v17 = vand.u32 2147483648, %v34_v9  ;;  %vm54_vm2 = vweird.f32 %v34_v9  ;;  %v58_v19 = vand.u32 2147483647, %v34_v9 }
  0x16   :  { %v47_v21 = vor.u32 1.1754944e-38, %v46_v13  ;;  %vm45_vm5 = vcmp.eq.f32.partialorder %v44_v16, 8.507059e+37 }
  0x17   :  { %v61_v24 = vor.u32 1.1754944e-38, %v60_v17  ;;  %vm59_vm7 = vcmp.eq.f32.partialorder %v58_v19, 8.507059e+37 }
  0x1a   :  { %v93_v10 = vpop.eup %92 }
  0x1b   :  { %v95_v11 = vpop.eup %94  ;;  %v36_v12 = vmul.f32 %v93_v10, %v33_v8  ;;  %vm41_vm1 = vweird.f32 %v93_v10 }
  0x1c   :  { %v50_v14 = vmul.f32 %v95_v11, %v34_v9  ;;  %vm55_vm3 = vweird.f32 %v95_v11  ;;  %vm42_vm4 = vmor %vm40_vm0, %vm41_vm1 }
  0x1d   :  { %v37_v15 = vsub.f32 1.0, %v36_v12  ;;  %vm56_vm6 = vmor %vm54_vm2, %vm55_vm3 }
  0x1e   :  { %v51_v18 = vsub.f32 1.0, %v50_v14 }
  0x1f   :  { %v38_v20 = vmul.f32 %v93_v10, %v37_v15 }
  0x20   :  { %v52_v22 = vmul.f32 %v95_v11, %v51_v18 }
  0x21   :  { %v39_v23 = vadd.f32 %v93_v10, %v38_v20 }
  0x22   :  { %v53_v25 = vadd.f32 %v95_v11, %v52_v22 }
  0x23   :  { %v43_v26 = vsel %vm42_vm4, %v93_v10, %v39_v23 }
  0x24   :  { %v48_v27 = vsel %vm45_vm5, %v47_v21, %v43_v26  ;;  %v57_v28 = vsel %vm56_vm6, %v95_v11, %v53_v25 }
  0x25   :  { %63 = vst [vmem:[#allocation5] sm:$0xff] %v48_v27  ;;  %v62_v29 = vsel %vm59_vm7, %v61_v24, %v57_v28 }
  0x26   :  { %64 = vst [vmem:[#allocation5 + $0x8] sm:$0xff] %v62_v29 }
  0x27   :  { %77 = dma.vmem_to_hbm [thread:$0]  %s70_s13, 256, %s72_s16, [#allocation4], %s149_s11, %s149_s11, %s150_s12  }
  0x28   :  { %146 = dma.done.wait [#allocation4], 256  }
  0x29   :  { %147 = vsyncadd [#allocation4], 4294967040 }
  0x2a   :  { %82 = vsyncpa [#allocation3], 1 }
  0x2b   :  { %83 = vsyncpa [#allocation4], 1 }

</bundles_post_ra>
